<compile_context>
chip_gen: v5e
topology: v5e:2x2
jax: 0.10.0
libtpu: 0.0.40
codegen_flags: <defaults>
</compile_context>

<pallas_src>
import functools

import jax
import jax.numpy as jnp
from jax.experimental import pallas as pl
from jax.experimental.pallas import tpu as pltpu

LANE = 128
SUBLANE = 8


def _round_up(v, m):
    return (v + m - 1) // m * m


def _cdiv(a, b):
    return (a + b - 1) // b


def _pad2d(x, rows, cols):
    r, c = x.shape
    if r == rows and c == cols:
        return x
    return jnp.pad(x, ((0, rows - r), (0, cols - c)))


def _default_vmem_limit():
    # ~96 MiB on v5e/v6e (128 MiB physical VMEM), ~48 MiB on v7x (64 MiB).
    try:
        cap = int(pltpu.get_tpu_info().vmem_capacity_bytes)
    except Exception:
        cap = 64 * 1024 * 1024
    return max(32 * 1024 * 1024, min(cap * 3 // 4, 96 * 1024 * 1024))


_VMEM_LIMIT = _default_vmem_limit()


def _k_tiling(k):
    """Pick (Kp, tk): Kp = nk * tk, tk a multiple of 128, tk <= 512-ish."""
    kp128 = _round_up(max(k, 1), LANE)
    nk = _cdiv(kp128, 512)
    tk = _round_up(_cdiv(kp128, nk), LANE)
    return tk * nk, tk


# ----------------------------------------------------------------------------
# Pallas kernels: K-tiled matmul, f32 VMEM accumulator, fused epilogue.
# ----------------------------------------------------------------------------
def _mm_bias_act_kernel(p_ref, w_ref, b_ref, o_ref, acc_ref, *, apply_relu):
    k = pl.program_id(2)

    @pl.when(k == 0)
    def _():
        acc_ref[...] = jnp.zeros_like(acc_ref)

    acc_ref[...] += jnp.dot(p_ref[...], w_ref[...],
                            preferred_element_type=jnp.float32)

    @pl.when(k == pl.num_programs(2) - 1)
    def _():
        y = acc_ref[...] + b_ref[...]
        if apply_relu:
            y = jnp.maximum(y, 0.0)
        o_ref[...] = y.astype(o_ref.dtype)


def _mm_bias_res_relu_kernel(p_ref, w_ref, b_ref, r_ref, o_ref, acc_ref):
    k = pl.program_id(2)

    @pl.when(k == 0)
    def _():
        acc_ref[...] = jnp.zeros_like(acc_ref)

    acc_ref[...] += jnp.dot(p_ref[...], w_ref[...],
                            preferred_element_type=jnp.float32)

    @pl.when(k == pl.num_programs(2) - 1)
    def _():
        y = acc_ref[...] + b_ref[...] + r_ref[...].astype(jnp.float32)
        o_ref[...] = jnp.maximum(y, 0.0).astype(o_ref.dtype)


# ----------------------------------------------------------------------------
# Tiled fused matmul wrapper
# ----------------------------------------------------------------------------
def _fused_matmul(patches, w2d, bias, *, tk, residual=None, apply_relu=True):
    """patches:(M,Kp) bf16 (K already zero-padded to nk*tk by the caller)
       w2d:(K,N) bf16 (BN scale folded)   bias:(1,N) f32
       residual:(M,N) bf16 identity shortcut, added before ReLU."""
    M, Kp = patches.shape
    K, N = w2d.shape
    Np = _round_up(N, LANE)
    nk = Kp // tk

    # N tiling: keep the whole padded N resident per M block when it fits
    # (gj == 1 -> the big LHS stream is read exactly once from HBM); fall back
    # to 256-wide tiles (full v6e/v7x MXU width) for very wide N.
    tn = Np if Np <= 512 else 256
    # M tiling: large tiles cut weight re-reads & per-step overhead; multiples
    # of 16 keep packed-bf16 sublane loads unmasked.
    tm = min(512, _round_up(M, 16))
    gi = _cdiv(M, tm)
    gj = Np // tn
    # v7x has 2 TensorCores: make sure a parallel axis has >= 2 steps.
    if gi * gj == 1 and M > 16:
        tm = _round_up(_cdiv(M, 2), 16)
        gi = _cdiv(M, tm)

    w = _pad2d(w2d, Kp, Np)          # small, pre-padded once (lane-dense)
    b = _pad2d(bias, 1, Np)

    if nk >= 3:
        # Deeper buffering on the weight stream hides DMA latency between
        # short MXU bursts once K is deep (tk*tn*2 bytes per extra buffer).
        w_spec = pl.BlockSpec((tk, tn), lambda i, j, k: (k, j),
                              pipeline_mode=pl.Buffered(3))
    else:
        w_spec = pl.BlockSpec((tk, tn), lambda i, j, k: (k, j))

    in_specs = [
        pl.BlockSpec((tm, tk), lambda i, j, k: (i, k)),
        w_spec,
        pl.BlockSpec((1, tn), lambda i, j, k: (0, j)),
    ]
    args = [patches, w, b]

    flops = 2 * M * Kp * Np
    bytes_accessed = (gj * M * Kp + gi * Kp * Np) * 2 + Np * 4 + M * Np * 2

    if residual is not None:
        r = _pad2d(residual.astype(jnp.bfloat16), M, Np)
        in_specs.append(pl.BlockSpec((tm, tn), lambda i, j, k: (i, j)))
        args.append(r)
        bytes_accessed += M * Np * 2
        kernel = _mm_bias_res_relu_kernel
    else:
        kernel = functools.partial(_mm_bias_act_kernel, apply_relu=apply_relu)

    out = pl.pallas_call(
        kernel,
        out_shape=jax.ShapeDtypeStruct((M, Np), jnp.bfloat16),  # bf16 output
        grid=(gi, gj, nk),
        in_specs=in_specs,
        out_specs=pl.BlockSpec((tm, tn), lambda i, j, k: (i, j)),
        scratch_shapes=[pltpu.VMEM((tm, tn), jnp.float32)],
        compiler_params=pltpu.CompilerParams(
            dimension_semantics=("parallel", "parallel", "arbitrary"),
            vmem_limit_bytes=_VMEM_LIMIT),
        cost_estimate=pl.CostEstimate(
            flops=flops, transcendentals=0, bytes_accessed=bytes_accessed),
    )(*args)
    return out if Np == N else out[:, :N]


# ----------------------------------------------------------------------------
# Plain-JAX glue: im2col (bf16, K padded in-place) and host-side BN folding.
# ----------------------------------------------------------------------------
def _build_patches(x_nhwc, stride, extra=None):
    """3x3 im2col (pad=1) of bf16 NHWC input. `extra` (fused 1x1-shortcut
    operand) is appended along K; K is zero-padded to the Pallas K-tile size
    inside the same concatenate (no separate jnp.pad pass over the big tensor).
    """
    B, H, W, C = x_nhwc.shape
    Ho = (H + 2 - 3) // stride + 1
    Wo = (W + 2 - 3) // stride + 1
    xp = jnp.pad(x_nhwc, ((0, 0), (1, 1), (1, 1), (0, 0))).astype(jnp.bfloat16)
    cols = []
    for kh in range(3):
        for kw in range(3):
            cols.append(xp[:,
                           kh:kh + (Ho - 1) * stride + 1:stride,
                           kw:kw + (Wo - 1) * stride + 1:stride, :])
    k = 9 * C
    if extra is not None:
        cols.append(extra.astype(jnp.bfloat16))
        k += extra.shape[-1]
    kp, tk = _k_tiling(k)
    if kp > k:
        cols.append(jnp.zeros((B, Ho, Wo, kp - k), jnp.bfloat16))
    patches = jnp.concatenate(cols, axis=-1).reshape(B * Ho * Wo, kp)
    return patches, tk, (B, Ho, Wo)


def _fold_conv_bn(w_oihw, bn, eps=1e-5):
    """Fold BN scale into the 2-D weight; return (w2d bf16, bias f32)."""
    gamma, beta, mean, var = bn
    scale = gamma / jnp.sqrt(var + eps)
    bias = beta - mean * scale
    cout, cin, kh, kw = w_oihw.shape
    w2d = jnp.transpose(w_oihw, (2, 3, 1, 0)).reshape(kh * kw * cin, cout)
    w2d = (w2d * scale[None, :]).astype(jnp.bfloat16)
    return w2d, bias.reshape(1, -1).astype(jnp.float32)


# ----------------------------------------------------------------------------
# Parameter construction (deterministic) + one-time folding
# ----------------------------------------------------------------------------
def _init_bn(key, planes):
    k1, k2, k3, k4 = jax.random.split(key, 4)
    gamma = 1.0 + 0.1 * jax.random.normal(k1, (planes,), jnp.float32)
    beta = 0.1 * jax.random.normal(k2, (planes,), jnp.float32)
    mean = 0.1 * jax.random.normal(k3, (planes,), jnp.float32)
    var = 1.0 + 0.1 * jax.random.uniform(k4, (planes,), jnp.float32)
    return (gamma, beta, mean, var)


def _init_block(key, in_planes, planes, stride):
    keys = jax.random.split(key, 6)
    params = {
        "w1": 0.1 * jax.random.normal(keys[0], (planes, in_planes, 3, 3), jnp.float32),
        "bn1": _init_bn(keys[1], planes),
        "w2": 0.1 * jax.random.normal(keys[2], (planes, planes, 3, 3), jnp.float32),
        "bn2": _init_bn(keys[3], planes),
        "stride": stride,
    }
    if stride != 1 or in_planes != planes:
        params["ws"] = 0.1 * jax.random.normal(
            keys[4], (planes, in_planes, 1, 1), jnp.float32)
        params["bns"] = _init_bn(keys[5], planes)
    return params


def init_sp_basic_layer(key, in_planes, planes, num_blocks, stride):
    strides = [stride] + [1] * (num_blocks - 1)
    blocks = []
    for s in strides:
        key, sub = jax.random.split(key)
        blocks.append(_init_block(sub, in_planes, planes, s))
        in_planes = planes
    return blocks


def fold_layer_params(raw_blocks):
    """One-time host-side prep: fold BN scale into weights, cast to bf16."""
    folded = []
    for p in raw_blocks:
        f = {"stride": p["stride"]}
        f["w1"], f["b1"] = _fold_conv_bn(p["w1"], p["bn1"])
        f["w2"], f["b2"] = _fold_conv_bn(p["w2"], p["bn2"])
        if "ws" in p:
            f["ws"], f["bs"] = _fold_conv_bn(p["ws"], p["bns"])
        folded.append(f)
    return folded


# ----------------------------------------------------------------------------
# Forward pass (matches SpBasicLayer.forward = nn.Sequential of BasicBlocks)
# ----------------------------------------------------------------------------
def basic_block_forward(x_nhwc, p):
    s = p["stride"]
    planes = p["w1"].shape[1]

    # conv1 (3x3, stride s) -> bn1 -> relu
    p1, tk1, (B, Ho, Wo) = _build_patches(x_nhwc, s)
    out1 = _fused_matmul(p1, p["w1"], p["b1"], tk=tk1, apply_relu=True)
    out1 = out1.reshape(B, Ho, Wo, planes)

    # conv2 (3x3, stride 1) -> bn2 -> (+ shortcut) -> relu, one fused matmul
    if "ws" in p:
        # 1x1 projection shortcut (stride s, pad 0): its strided operand and
        # weight rows ride along the main K stream (single MXU accumulator).
        xs = x_nhwc[:, ::s, ::s, :][:, :Ho, :Wo, :]
        p2, tk2, _ = _build_patches(out1, 1, extra=xs)
        wcat = jnp.concatenate([p["w2"], p["ws"]], axis=0)
        bcat = p["b2"] + p["bs"]
        out2 = _fused_matmul(p2, wcat, bcat, tk=tk2, apply_relu=True)
    else:
        p2, tk2, _ = _build_patches(out1, 1)
        res = x_nhwc.reshape(B * Ho * Wo, planes)
        out2 = _fused_matmul(p2, p["w2"], p["b2"], tk=tk2,
                             residual=res, apply_relu=True)
    return out2.reshape(B, Ho, Wo, planes)


def sp_basic_layer_forward(x_nchw, folded_params):
    # bf16 activations end-to-end (f32 MXU accumulation inside the kernels).
    x = jnp.transpose(x_nchw, (0, 2, 3, 1)).astype(jnp.bfloat16)  # NCHW->NHWC
    for p in folded_params:
        x = basic_block_forward(x, p)
    return jnp.transpose(x, (0, 3, 1, 2)).astype(jnp.float32)     # NHWC->NCHW


# ----------------------------------------------------------------------------
if __name__ == "__main__":
    key = jax.random.PRNGKey(0)
    kx, kp = jax.random.split(key)

    # SpBasicLayer(in_planes=4, planes=8, num_blocks=2, stride=2)
    B, Cin, H, W = 2, 4, 16, 16
    planes, num_blocks, stride = 8, 2, 2

    x = jax.random.normal(kx, (B, Cin, H, W), jnp.float32)
    raw_params = init_sp_basic_layer(kp, Cin, planes, num_blocks, stride)
    params = fold_layer_params(raw_params)

    fwd = jax.jit(lambda t: sp_basic_layer_forward(t, params))
    out = jax.block_until_ready(fwd(x))
    assert out.shape == (B, planes, H // stride, W // stride), out.shape
    assert bool(jnp.all(jnp.isfinite(out)))
    print("KERNEL_OK")
</pallas_src>

<mosaic_0001>
module attributes {stable_mosaic.version = 11 : i64} {
  func.func @_mm_bias_act_kernel(%arg0: i32, %arg1: i32, %arg2: i32, %arg3: memref<64x128xbf16, #tpu.memory_space<vmem>>, %arg4: memref<128x128xbf16, #tpu.memory_space<vmem>>, %arg5: memref<1x128xf32, #tpu.memory_space<vmem>>, %arg6: memref<64x128xbf16, #tpu.memory_space<vmem>>, %arg7: memref<64x128xf32, #tpu.memory_space<vmem>>) attributes {dimension_semantics = [#tpu.dimension_semantics<parallel>, #tpu.dimension_semantics<parallel>, #tpu.dimension_semantics<arbitrary>], iteration_bounds = array<i64: 2, 1, 1>, scalar_prefetch = 0 : i64, scratch_operands = 1 : i64, tpu.core_type = #tpu.core_type<tc>, window_params = [{transform_indices = @transform_0, window_bounds = array<i64: 64, 128>}, {transform_indices = @transform_1, window_bounds = array<i64: 128, 128>}, {transform_indices = @transform_2, window_bounds = array<i64: 1, 128>}, {transform_indices = @transform_3, window_bounds = array<i64: 64, 128>}]} {
    %c0_i32 = arith.constant 0 : i32
    %0 = arith.cmpi eq, %arg2, %c0_i32 : i32
    %1 = arith.extui %0 : i1 to i32
    %c0_i32_0 = arith.constant 0 : i32
    %2 = arith.cmpi ne, %1, %c0_i32_0 : i32
    scf.if %2 {
      %cst_10 = arith.constant 0.000000e+00 : f32
      %12 = vector.broadcast %cst_10 : f32 to vector<64x128xf32>
      %c0_11 = arith.constant 0 : index
      %c0_12 = arith.constant 0 : index
      %13 = vector.load %arg7[%c0_11, %c0_12] : memref<64x128xf32, #tpu.memory_space<vmem>>, vector<64x128xf32>
      tpu.vector_store %arg7[%c0_11, %c0_12], %12 {strides = array<i32>} : memref<64x128xf32, #tpu.memory_space<vmem>>, vector<64x128xf32>,
    } else {
    }
    %c0 = arith.constant 0 : index
    %c0_1 = arith.constant 0 : index
    %3 = vector.load %arg7[%c0, %c0_1] : memref<64x128xf32, #tpu.memory_space<vmem>>, vector<64x128xf32>
    %c0_2 = arith.constant 0 : index
    %c0_3 = arith.constant 0 : index
    %4 = vector.load %arg3[%c0_2, %c0_3] : memref<64x128xbf16, #tpu.memory_space<vmem>>, vector<64x128xbf16>
    %c0_4 = arith.constant 0 : index
    %c0_5 = arith.constant 0 : index
    %5 = vector.load %arg4[%c0_4, %c0_5] : memref<128x128xbf16, #tpu.memory_space<vmem>>, vector<128x128xbf16>
    %cst = arith.constant dense<0.000000e+00> : vector<64x128xf32>
    %6 = tpu.matmul %4, %5, %cst {dimension_numbers = #tpu.dot_dimension_numbers<[1], [0], [0], [1], [0, 0, 1, 1], [], []>} : vector<64x128xbf16>, vector<128x128xbf16>, vector<64x128xf32> -> vector<64x128xf32>
    %7 = arith.addf %3, %6 : vector<64x128xf32>
    %c0_6 = arith.constant 0 : index
    %c0_7 = arith.constant 0 : index
    %8 = vector.load %arg7[%c0_6, %c0_7] : memref<64x128xf32, #tpu.memory_space<vmem>>, vector<64x128xf32>
    tpu.vector_store %arg7[%c0_6, %c0_7], %7 {strides = array<i32>} : memref<64x128xf32, #tpu.memory_space<vmem>>, vector<64x128xf32>,
    %c0_i32_8 = arith.constant 0 : i32
    %9 = arith.cmpi eq, %arg2, %c0_i32_8 : i32
    %10 = arith.extui %9 : i1 to i32
    %c0_i32_9 = arith.constant 0 : i32
    %11 = arith.cmpi ne, %10, %c0_i32_9 : i32
    scf.if %11 {
      %c0_10 = arith.constant 0 : index
      %c0_11 = arith.constant 0 : index
      %12 = vector.load %arg7[%c0_10, %c0_11] : memref<64x128xf32, #tpu.memory_space<vmem>>, vector<64x128xf32>
      %c0_12 = arith.constant 0 : index
      %c0_13 = arith.constant 0 : index
      %13 = vector.load %arg5[%c0_12, %c0_13] : memref<1x128xf32, #tpu.memory_space<vmem>>, vector<1x128xf32>
      %14 = vector.broadcast %13 : vector<1x128xf32> to vector<64x128xf32>
      %15 = arith.addf %12, %14 : vector<64x128xf32>
      %cst_14 = arith.constant 0.000000e+00 : f32
      %16 = vector.broadcast %cst_14 : f32 to vector<64x128xf32>
      %17 = arith.maximumf %15, %16 : vector<64x128xf32>
      %18 = arith.truncf %17 : vector<64x128xf32> to vector<64x128xbf16>
      %c0_15 = arith.constant 0 : index
      %c0_16 = arith.constant 0 : index
      %19 = vector.load %arg6[%c0_15, %c0_16] : memref<64x128xbf16, #tpu.memory_space<vmem>>, vector<64x128xbf16>
      tpu.vector_store %arg6[%c0_15, %c0_16], %18 {strides = array<i32>} : memref<64x128xbf16, #tpu.memory_space<vmem>>, vector<64x128xbf16>,
    } else {
    }
    return
  }
  func.func @transform_0(%arg0: i32, %arg1: i32, %arg2: i32) -> (i32, i32) {
    %c0_i32 = arith.constant 0 : i32
    return %arg0, %arg2 : i32, i32
  }
  func.func @transform_1(%arg0: i32, %arg1: i32, %arg2: i32) -> (i32, i32) {
    %c0_i32 = arith.constant 0 : i32
    return %arg2, %arg1 : i32, i32
  }
  func.func @transform_2(%arg0: i32, %arg1: i32, %arg2: i32) -> (i32, i32) {
    %c0_i32 = arith.constant 0 : i32
    %c0_i32_0 = arith.constant 0 : i32
    return %c0_i32, %arg1 : i32, i32
  }
  func.func @transform_3(%arg0: i32, %arg1: i32, %arg2: i32) -> (i32, i32) {
    %c0_i32 = arith.constant 0 : i32
    return %arg0, %arg1 : i32, i32
  }
}

module attributes {stable_mosaic.version = 11 : i64} {
  func.func @_mm_bias_res_relu_kernel(%arg0: i32, %arg1: i32, %arg2: i32, %arg3: memref<64x128xbf16, #tpu.memory_space<vmem>>, %arg4: memref<128x128xbf16, #tpu.memory_space<vmem>>, %arg5: memref<1x128xf32, #tpu.memory_space<vmem>>, %arg6: memref<64x128xbf16, #tpu.memory_space<vmem>>, %arg7: memref<64x128xbf16, #tpu.memory_space<vmem>>, %arg8: memref<64x128xf32, #tpu.memory_space<vmem>>) attributes {dimension_semantics = [#tpu.dimension_semantics<parallel>, #tpu.dimension_semantics<parallel>, #tpu.dimension_semantics<arbitrary>], iteration_bounds = array<i64: 2, 1, 1>, scalar_prefetch = 0 : i64, scratch_operands = 1 : i64, tpu.core_type = #tpu.core_type<tc>, window_params = [{transform_indices = @transform_0, window_bounds = array<i64: 64, 128>}, {transform_indices = @transform_1, window_bounds = array<i64: 128, 128>}, {transform_indices = @transform_2, window_bounds = array<i64: 1, 128>}, {transform_indices = @transform_3, window_bounds = array<i64: 64, 128>}, {transform_indices = @transform_4, window_bounds = array<i64: 64, 128>}]} {
    %c0_i32 = arith.constant 0 : i32
    %0 = arith.cmpi eq, %arg2, %c0_i32 : i32
    %1 = arith.extui %0 : i1 to i32
    %c0_i32_0 = arith.constant 0 : i32
    %2 = arith.cmpi ne, %1, %c0_i32_0 : i32
    scf.if %2 {
      %cst_10 = arith.constant 0.000000e+00 : f32
      %12 = vector.broadcast %cst_10 : f32 to vector<64x128xf32>
      %c0_11 = arith.constant 0 : index
      %c0_12 = arith.constant 0 : index
      %13 = vector.load %arg8[%c0_11, %c0_12] : memref<64x128xf32, #tpu.memory_space<vmem>>, vector<64x128xf32>
      tpu.vector_store %arg8[%c0_11, %c0_12], %12 {strides = array<i32>} : memref<64x128xf32, #tpu.memory_space<vmem>>, vector<64x128xf32>,
    } else {
    }
    %c0 = arith.constant 0 : index
    %c0_1 = arith.constant 0 : index
    %3 = vector.load %arg8[%c0, %c0_1] : memref<64x128xf32, #tpu.memory_space<vmem>>, vector<64x128xf32>
    %c0_2 = arith.constant 0 : index
    %c0_3 = arith.constant 0 : index
    %4 = vector.load %arg3[%c0_2, %c0_3] : memref<64x128xbf16, #tpu.memory_space<vmem>>, vector<64x128xbf16>
    %c0_4 = arith.constant 0 : index
    %c0_5 = arith.constant 0 : index
    %5 = vector.load %arg4[%c0_4, %c0_5] : memref<128x128xbf16, #tpu.memory_space<vmem>>, vector<128x128xbf16>
    %cst = arith.constant dense<0.000000e+00> : vector<64x128xf32>
    %6 = tpu.matmul %4, %5, %cst {dimension_numbers = #tpu.dot_dimension_numbers<[1], [0], [0], [1], [0, 0, 1, 1], [], []>} : vector<64x128xbf16>, vector<128x128xbf16>, vector<64x128xf32> -> vector<64x128xf32>
    %7 = arith.addf %3, %6 : vector<64x128xf32>
    %c0_6 = arith.constant 0 : index
    %c0_7 = arith.constant 0 : index
    %8 = vector.load %arg8[%c0_6, %c0_7] : memref<64x128xf32, #tpu.memory_space<vmem>>, vector<64x128xf32>
    tpu.vector_store %arg8[%c0_6, %c0_7], %7 {strides = array<i32>} : memref<64x128xf32, #tpu.memory_space<vmem>>, vector<64x128xf32>,
    %c0_i32_8 = arith.constant 0 : i32
    %9 = arith.cmpi eq, %arg2, %c0_i32_8 : i32
    %10 = arith.extui %9 : i1 to i32
    %c0_i32_9 = arith.constant 0 : i32
    %11 = arith.cmpi ne, %10, %c0_i32_9 : i32
    scf.if %11 {
      %c0_10 = arith.constant 0 : index
      %c0_11 = arith.constant 0 : index
      %12 = vector.load %arg8[%c0_10, %c0_11] : memref<64x128xf32, #tpu.memory_space<vmem>>, vector<64x128xf32>
      %c0_12 = arith.constant 0 : index
      %c0_13 = arith.constant 0 : index
      %13 = vector.load %arg5[%c0_12, %c0_13] : memref<1x128xf32, #tpu.memory_space<vmem>>, vector<1x128xf32>
      %14 = vector.broadcast %13 : vector<1x128xf32> to vector<64x128xf32>
      %15 = arith.addf %12, %14 : vector<64x128xf32>
      %c0_14 = arith.constant 0 : index
      %c0_15 = arith.constant 0 : index
      %16 = vector.load %arg6[%c0_14, %c0_15] : memref<64x128xbf16, #tpu.memory_space<vmem>>, vector<64x128xbf16>
      %17 = arith.extf %16 : vector<64x128xbf16> to vector<64x128xf32>
      %18 = arith.addf %15, %17 : vector<64x128xf32>
      %cst_16 = arith.constant 0.000000e+00 : f32
      %19 = vector.broadcast %cst_16 : f32 to vector<64x128xf32>
      %20 = arith.maximumf %18, %19 : vector<64x128xf32>
      %21 = arith.truncf %20 : vector<64x128xf32> to vector<64x128xbf16>
      %c0_17 = arith.constant 0 : index
      %c0_18 = arith.constant 0 : index
      %22 = vector.load %arg7[%c0_17, %c0_18] : memref<64x128xbf16, #tpu.memory_space<vmem>>, vector<64x128xbf16>
      tpu.vector_store %arg7[%c0_17, %c0_18], %21 {strides = array<i32>} : memref<64x128xbf16, #tpu.memory_space<vmem>>, vector<64x128xbf16>,
    } else {
    }
    return
  }
  func.func @transform_0(%arg0: i32, %arg1: i32, %arg2: i32) -> (i32, i32) {
    %c0_i32 = arith.constant 0 : i32
    return %arg0, %arg2 : i32, i32
  }
  func.func @transform_1(%arg0: i32, %arg1: i32, %arg2: i32) -> (i32, i32) {
    %c0_i32 = arith.constant 0 : i32
    return %arg2, %arg1 : i32, i32
  }
  func.func @transform_2(%arg0: i32, %arg1: i32, %arg2: i32) -> (i32, i32) {
    %c0_i32 = arith.constant 0 : i32
    %c0_i32_0 = arith.constant 0 : i32
    return %c0_i32, %arg1 : i32, i32
  }
  func.func @transform_3(%arg0: i32, %arg1: i32, %arg2: i32) -> (i32, i32) {
    %c0_i32 = arith.constant 0 : i32
    return %arg0, %arg1 : i32, i32
  }
  func.func @transform_4(%arg0: i32, %arg1: i32, %arg2: i32) -> (i32, i32) {
    %c0_i32 = arith.constant 0 : i32
    return %arg0, %arg1 : i32, i32
  }
}

</mosaic_0001>

<bundles_post_ra>
// kernel: _lambda_.4
= control target key start
LH: loop header
LB: loop body
LE: loop exit
PB: predicated region body
PF: predicated region fallthrough
CT: control target
= control target key end

     0   :  { %s767_s12 = smov 0   ;;  %s769_s13 = smov 0   ;;  %s837_s0 = inlined_call_operand.vmem [shape: bf16[128,128], index: 0, kind: input, shape index: {}]   ;;  %s838_s1 = inlined_call_operand.vmem [shape: bf16[128,128], index: 1, kind: input, shape index: {}]   ;;  %s839_s2 = inlined_call_operand.vmem [shape: f32[1,128], index: 2, kind: input, shape index: {}]   ;;  %s840_s3 = inlined_call_operand.vmem [shape: bf16[128,128], index: 3, kind: output, shape index: {}]  }
   0x1   :  { %s771_s14 = smov 0  }
   0x2 LB: > { %s32_s15 = sadd.s32 1, %s741_s13  ;;  %p584_p0 = scmp.ge.s32.totalorder %s745_s14, 1  ;;  %s745_s14 = sphi %s771_s14, %s13_s14   ;;  %s741_s13 = sphi %s769_s13, %s842_s13   ;;  %s737_s12 = sphi %s767_s12, %s841_s12  }
   0x3   : > { %p34_p1 = scmp.ge.s32.totalorder %s32_s15, 2  ;;  %p188_p2 = scmp.lt.s32.totalorder %s745_s14, 3 }
   0x5   : > { %s844_s15 = smov (%p34_p1, %s32_s15), 0  ;;  %p189_p3 = pnand %p584_p0, %p188_p2 }
   0x6   : > { %s585_s24 = sshll.u32 (!%p189_p3), %s737_s12, 3 }
   0x7   : > { %192 = sbr.rel (%p189_p3) target bundleno = 193 (0xc1), region = 32  ;;  %p230_p4 = scmp.lt.s32.totalorder (!%p189_p3), %s585_s24, 15 }
   0xc   : > { %v650_v0 = vld [vmem:[%s838_s1 + $0x38] sm:$0xff]  ;;  %v649_v1 = vld [vmem:[%s838_s1 + $0x30] sm:$0xff]  ;;  %v648_v2 = vld [vmem:[%s838_s1 + $0x28] sm:$0xff]  ;;  %s846_s24 = smov (!%p230_p4, %s585_s24), 15 }
   0xd   : > { %375 = vmatpush.bf16.msra.mxu0 %v650_v0  ;;  %674 = vmatpush.bf16.msra.mxu1 %v650_v0  ;;  %v647_v3 = vld [vmem:[%s838_s1 + $0x20] sm:$0xff]  ;;  %v646_v4 = vld [vmem:[%s838_s1 + $0x18] sm:$0xff]  ;;  %v645_v5 = vld [vmem:[%s838_s1 + $0x10] sm:$0xff]  ;;  %s586_s4 = sshll.u32 %s846_s24, 2 }
   0xe   : > { %675 = vmatpush.bf16.msra.mxu2 %v650_v0  ;;  %676 = vmatpush.bf16.msra.mxu3 %v650_v0  ;;  %v644_v6 = vld [vmem:[%s838_s1 + $0x8] sm:$0xff]  ;;  %v643_v7 = vld [vmem:[%s838_s1] sm:$0xff]  ;;  %s236_s9 = scalar_lea.vmem %s837_s0, %s586_s4  ;;  %s257_s17 = scalar_lea.vmem %s840_s3, %s586_s4 }
   0xf   : > { %v639_v8 = vld [vmem:[%s236_s9] sm:$0xff]  ;;  %v640_v9 = vld [vmem:[%s236_s9 + $0x8] sm:$0xff]  ;;  %v641_v10 = vld [vmem:[%s236_s9 + $0x10] sm:$0xff] }
  0x10   : > { %v642_v11 = vld [vmem:[%s236_s9 + $0x18] sm:$0xff]  ;;  %v722_v14 = vld [vmem:[%s839_s2] ss:$0 sm:$0xff] }
  0x11   : > { %376 = vmatpush.bf16.msra.mxu0 %v649_v1  ;;  %677 = vmatpush.bf16.msra.mxu1 %v649_v1 }
  0x12   : > { %678 = vmatpush.bf16.msra.mxu2 %v649_v1  ;;  %679 = vmatpush.bf16.msra.mxu3 %v649_v1 }
  0x15   : > { %377 = vmatpush.bf16.msra.mxu0 %v648_v2  ;;  %680 = vmatpush.bf16.msra.mxu1 %v648_v2 }
  0x16   : > { %681 = vmatpush.bf16.msra.mxu2 %v648_v2  ;;  %682 = vmatpush.bf16.msra.mxu3 %v648_v2 }
  0x19   : > { %378 = vmatpush.bf16.msra.mxu0 %v647_v3  ;;  %683 = vmatpush.bf16.msra.mxu1 %v647_v3 }
  0x1a   : > { %684 = vmatpush.bf16.msra.mxu2 %v647_v3  ;;  %685 = vmatpush.bf16.msra.mxu3 %v647_v3 }
  0x1d   : > { %379 = vmatpush.bf16.msra.mxu0 %v646_v4  ;;  %686 = vmatpush.bf16.msra.mxu1 %v646_v4 }
  0x1e   : > { %687 = vmatpush.bf16.msra.mxu2 %v646_v4  ;;  %688 = vmatpush.bf16.msra.mxu3 %v646_v4 }
  0x21   : > { %380 = vmatpush.bf16.msra.mxu0 %v645_v5  ;;  %689 = vmatpush.bf16.msra.mxu1 %v645_v5 }
  0x22   : > { %690 = vmatpush.bf16.msra.mxu2 %v645_v5  ;;  %691 = vmatpush.bf16.msra.mxu3 %v645_v5 }
  0x25   : > { %381 = vmatpush.bf16.msra.mxu0 %v644_v6  ;;  %692 = vmatpush.bf16.msra.mxu1 %v644_v6 }
  0x26   : > { %693 = vmatpush.bf16.msra.mxu2 %v644_v6  ;;  %694 = vmatpush.bf16.msra.mxu3 %v644_v6 }
  0x29   : > { %382 = vmatpush.bf16.msra.mxu0 %v643_v7  ;;  %695 = vmatpush.bf16.msra.mxu1 %v643_v7 }
  0x2a   : > { %696 = vmatpush.bf16.msra.mxu2 %v643_v7  ;;  %697 = vmatpush.bf16.msra.mxu3 %v643_v7 }
  0x2c   : > { %383 = vmatmul.bf16.vlgmr.msra.gmra.mxu0 %v639_v8  ;;  %388 = vmatmul.bf16.vlgmr.msra.gmra.mxu1 %v640_v9 }
  0x2d   : > { %393 = vmatmul.bf16.vlgmr.msra.gmra.mxu2 %v641_v10  ;;  %398 = vmatmul.bf16.vlgmr.msra.gmra.mxu3 %v642_v11 }
  0xa9   : > { %v384_v12 = vpop.f32.mrf.mxu0  ;;  %v389_v13 = vpop.f32.mrf.mxu1 }
  0xaa   : > { %v435_v15 = vadd.f32 %v722_v14, %v384_v12  ;;  %v437_v16 = vadd.f32 %v722_v14, %v389_v13 }
  0xac   : > { %v443_v23 = vmax.f32 %v435_v15, 0.0  ;;  %v445_v24 = vmax.f32 %v437_v16, 0.0 }
  0xb0   : > { %v394_v17 = vpop.f32.mrf.mxu2  ;;  %v399_v18 = vpop.f32.mrf.mxu3 }
  0xb1   : > { %v386_v19 = vpop.f32.mrf.mxu0  ;;  %v391_v20 = vpop.f32.mrf.mxu1  ;;  %v439_v29 = vadd.f32 %v722_v14, %v394_v17  ;;  %v441_v30 = vadd.f32 %v722_v14, %v399_v18 }
  0xb2   : > { %v436_v21 = vadd.f32 %v722_v14, %v386_v19  ;;  %v438_v22 = vadd.f32 %v722_v14, %v391_v20 }
  0xb3   : > { %v447_v35 = vmax.f32 %v439_v29, 0.0  ;;  %v449_v36 = vmax.f32 %v441_v30, 0.0 }
  0xb4   : > { %v444_v25 = vmax.f32 %v436_v21, 0.0  ;;  %v446_v26 = vmax.f32 %v438_v22, 0.0 }
  0xb6   : > { %v654_v27 = vpack.c.bf16 %v444_v25, %v443_v23  ;;  %v659_v28 = vpack.c.bf16 %v446_v26, %v445_v24 }
  0xb8   : > { %655 = vst [vmem:[%s257_s17] sm:$0xff] %v654_v27   ;;  %v396_v31 = vpop.f32.mrf.mxu2  ;;  %v401_v32 = vpop.f32.mrf.mxu3 }
  0xb9   : > { %671 = vst [vmem:[%s257_s17 + $0x8] sm:$0xff] %v659_v28   ;;  %v440_v33 = vadd.f32 %v722_v14, %v396_v31  ;;  %v442_v34 = vadd.f32 %v722_v14, %v401_v32 }
  0xbb   : > { %v448_v37 = vmax.f32 %v440_v33, 0.0  ;;  %v450_v38 = vmax.f32 %v442_v34, 0.0 }
  0xbd   : > { %v664_v39 = vpack.c.bf16 %v448_v37, %v447_v35  ;;  %v669_v40 = vpack.c.bf16 %v450_v38, %v449_v36 }
  0xbf   : > { %672 = vst [vmem:[%s257_s17 + $0x10] sm:$0xff] %v664_v39  }
  0xc0   : > { %673 = vst [vmem:[%s257_s17 + $0x18] sm:$0xff] %v669_v40  }
  0xc1 PF: > { %s13_s14 = sadd.s32 1, %s745_s14   ;;  %s841_s12 = smov %s741_s13 }
  0xc2   : > { %p10_p5 = scmp.ge.s32.totalorder %s13_s14, 4   ;;  %s842_s13 = smov %s844_s15 }
  0xc4   :  { %12 = sbr.rel (!%p10_p5) target bundleno = 2 (0x2), region = 76 }

// kernel: _lambda_.7
= control target key start
LH: loop header
LB: loop body
LE: loop exit
PB: predicated region body
PF: predicated region fallthrough
CT: control target
= control target key end

     0   :  { %s892_s15 = smov 0   ;;  %s894_s16 = smov 0   ;;  %s963_s0 = inlined_call_operand.vmem [shape: bf16[128,128], index: 0, kind: input, shape index: {}]   ;;  %s964_s1 = inlined_call_operand.vmem [shape: bf16[128,128], index: 1, kind: input, shape index: {}]   ;;  %s965_s2 = inlined_call_operand.vmem [shape: f32[1,128], index: 2, kind: input, shape index: {}]   ;;  %s966_s3 = inlined_call_operand.vmem [shape: bf16[128,128], index: 3, kind: input, shape index: {}]   ;;  %s967_s4 = inlined_call_operand.vmem [shape: bf16[128,128], index: 4, kind: output, shape index: {}]  }
   0x1   :  { %s896_s17 = smov 0  }
   0x2 LB: > { %s33_s18 = sadd.s32 1, %s861_s16  ;;  %p683_p0 = scmp.ge.s32.totalorder %s865_s17, 1  ;;  %s865_s17 = sphi %s896_s17, %s14_s17   ;;  %s861_s16 = sphi %s894_s16, %s969_s16   ;;  %s857_s15 = sphi %s892_s15, %s968_s15  }
   0x3   : > { %p35_p1 = scmp.ge.s32.totalorder %s33_s18, 2  ;;  %p229_p2 = scmp.lt.s32.totalorder %s865_s17, 3 }
   0x5   : > { %s971_s18 = smov (%p35_p1, %s33_s18), 0  ;;  %p230_p3 = pnand %p683_p0, %p229_p2 }
   0x6   : > { %s684_s27 = sshll.u32 (!%p230_p3), %s857_s15, 3 }
   0x7   : > { %233 = sbr.rel (%p230_p3) target bundleno = 195 (0xc3), region = 36  ;;  %p281_p4 = scmp.lt.s32.totalorder (!%p230_p3), %s684_s27, 15 }
   0xc   : > { %v751_v0 = vld [vmem:[%s964_s1 + $0x38] sm:$0xff]  ;;  %v750_v1 = vld [vmem:[%s964_s1 + $0x30] sm:$0xff]  ;;  %v749_v2 = vld [vmem:[%s964_s1 + $0x28] sm:$0xff]  ;;  %s973_s27 = smov (!%p281_p4, %s684_s27), 15 }
   0xd   : > { %435 = vmatpush.bf16.msra.mxu0 %v751_v0  ;;  %794 = vmatpush.bf16.msra.mxu1 %v751_v0  ;;  %v748_v3 = vld [vmem:[%s964_s1 + $0x20] sm:$0xff]  ;;  %v747_v4 = vld [vmem:[%s964_s1 + $0x18] sm:$0xff]  ;;  %v746_v5 = vld [vmem:[%s964_s1 + $0x10] sm:$0xff]  ;;  %s934_s8 = sshll.u32 %s973_s27, 2 }
   0xe   : > { %795 = vmatpush.bf16.msra.mxu2 %v751_v0  ;;  %796 = vmatpush.bf16.msra.mxu3 %v751_v0  ;;  %v745_v6 = vld [vmem:[%s964_s1 + $0x8] sm:$0xff]  ;;  %v744_v7 = vld [vmem:[%s964_s1] sm:$0xff]  ;;  %s287_s13 = scalar_lea.vmem %s963_s0, %s934_s8  ;;  %s308_s19 = scalar_lea.vmem %s966_s3, %s934_s8 }
   0xf   : > { %v740_v8 = vld [vmem:[%s287_s13] sm:$0xff]  ;;  %v741_v9 = vld [vmem:[%s287_s13 + $0x8] sm:$0xff]  ;;  %v742_v10 = vld [vmem:[%s287_s13 + $0x10] sm:$0xff]  ;;  %s317_s24 = scalar_lea.vmem %s967_s4, %s934_s8 }
  0x10   : > { %v743_v11 = vld [vmem:[%s287_s13 + $0x18] sm:$0xff]  ;;  %v842_v14 = vld [vmem:[%s965_s2] ss:$0 sm:$0xff]  ;;  %v788_v16 = vld [vmem:[%s308_s19 + $0x8] sm:$0xff]  }
  0x11   : > { %436 = vmatpush.bf16.msra.mxu0 %v750_v1  ;;  %797 = vmatpush.bf16.msra.mxu1 %v750_v1  ;;  %v753_v15 = vld [vmem:[%s308_s19] sm:$0xff]   ;;  %v758_v20 = vunpack.c.l.bf16 %v788_v16  ;;  %v759_v24 = vunpack.c.h.bf16 %v788_v16  ;;  %v789_v29 = vld [vmem:[%s308_s19 + $0x10] sm:$0xff]   ;;  %v790_v30 = vld [vmem:[%s308_s19 + $0x18] sm:$0xff]  }
  0x12   : > { %798 = vmatpush.bf16.msra.mxu2 %v750_v1  ;;  %799 = vmatpush.bf16.msra.mxu3 %v750_v1  ;;  %v754_v18 = vunpack.c.l.bf16 %v753_v15  ;;  %v755_v23 = vunpack.c.h.bf16 %v753_v15  ;;  %v762_v36 = vunpack.c.l.bf16 %v789_v29  ;;  %v766_v38 = vunpack.c.l.bf16 %v790_v30 }
  0x13   : > { %v763_v43 = vunpack.c.h.bf16 %v789_v29  ;;  %v767_v44 = vunpack.c.h.bf16 %v790_v30 }
  0x15   : > { %437 = vmatpush.bf16.msra.mxu0 %v749_v2  ;;  %800 = vmatpush.bf16.msra.mxu1 %v749_v2 }
  0x16   : > { %801 = vmatpush.bf16.msra.mxu2 %v749_v2  ;;  %802 = vmatpush.bf16.msra.mxu3 %v749_v2 }
  0x19   : > { %438 = vmatpush.bf16.msra.mxu0 %v748_v3  ;;  %803 = vmatpush.bf16.msra.mxu1 %v748_v3 }
  0x1a   : > { %804 = vmatpush.bf16.msra.mxu2 %v748_v3  ;;  %805 = vmatpush.bf16.msra.mxu3 %v748_v3 }
  0x1d   : > { %439 = vmatpush.bf16.msra.mxu0 %v747_v4  ;;  %806 = vmatpush.bf16.msra.mxu1 %v747_v4 }
  0x1e   : > { %807 = vmatpush.bf16.msra.mxu2 %v747_v4  ;;  %808 = vmatpush.bf16.msra.mxu3 %v747_v4 }
  0x21   : > { %440 = vmatpush.bf16.msra.mxu0 %v746_v5  ;;  %809 = vmatpush.bf16.msra.mxu1 %v746_v5 }
  0x22   : > { %810 = vmatpush.bf16.msra.mxu2 %v746_v5  ;;  %811 = vmatpush.bf16.msra.mxu3 %v746_v5 }
  0x25   : > { %441 = vmatpush.bf16.msra.mxu0 %v745_v6  ;;  %812 = vmatpush.bf16.msra.mxu1 %v745_v6 }
  0x26   : > { %813 = vmatpush.bf16.msra.mxu2 %v745_v6  ;;  %814 = vmatpush.bf16.msra.mxu3 %v745_v6 }
  0x29   : > { %442 = vmatpush.bf16.msra.mxu0 %v744_v7  ;;  %815 = vmatpush.bf16.msra.mxu1 %v744_v7 }
  0x2a   : > { %816 = vmatpush.bf16.msra.mxu2 %v744_v7  ;;  %817 = vmatpush.bf16.msra.mxu3 %v744_v7 }
  0x2c   : > { %443 = vmatmul.bf16.vlgmr.msra.gmra.mxu0 %v740_v8  ;;  %448 = vmatmul.bf16.vlgmr.msra.gmra.mxu1 %v741_v9 }
  0x2d   : > { %453 = vmatmul.bf16.vlgmr.msra.gmra.mxu2 %v742_v10  ;;  %458 = vmatmul.bf16.vlgmr.msra.gmra.mxu3 %v743_v11 }
  0xa9   : > { %v444_v12 = vpop.f32.mrf.mxu0  ;;  %v449_v13 = vpop.f32.mrf.mxu1 }
  0xaa   : > { %v495_v17 = vadd.f32 %v842_v14, %v444_v12  ;;  %v497_v19 = vadd.f32 %v842_v14, %v449_v13 }
  0xac   : > { %v519_v27 = vadd.f32 %v754_v18, %v495_v17  ;;  %v521_v28 = vadd.f32 %v758_v20, %v497_v19 }
  0xae   : > { %v527_v39 = vmax.f32 %v519_v27, 0.0  ;;  %v529_v40 = vmax.f32 %v521_v28, 0.0 }
  0xb0   : > { %v454_v21 = vpop.f32.mrf.mxu2  ;;  %v459_v22 = vpop.f32.mrf.mxu3 }
  0xb1   : > { %v446_v25 = vpop.f32.mrf.mxu0  ;;  %v451_v26 = vpop.f32.mrf.mxu1  ;;  %v499_v35 = vadd.f32 %v842_v14, %v454_v21  ;;  %v501_v37 = vadd.f32 %v842_v14, %v459_v22 }
  0xb2   : > { %v496_v31 = vadd.f32 %v842_v14, %v446_v25  ;;  %v498_v32 = vadd.f32 %v842_v14, %v451_v26 }
  0xb3   : > { %v523_v49 = vadd.f32 %v762_v36, %v499_v35  ;;  %v525_v50 = vadd.f32 %v766_v38, %v501_v37 }
  0xb4   : > { %v520_v33 = vadd.f32 %v755_v23, %v496_v31  ;;  %v522_v34 = vadd.f32 %v759_v24, %v498_v32 }
  0xb5   : > { %v531_v55 = vmax.f32 %v523_v49, 0.0  ;;  %v533_v56 = vmax.f32 %v525_v50, 0.0 }
  0xb6   : > { %v528_v41 = vmax.f32 %v520_v33, 0.0  ;;  %v530_v42 = vmax.f32 %v522_v34, 0.0 }
  0xb8   : > { %v771_v45 = vpack.c.bf16 %v528_v41, %v527_v39  ;;  %v776_v46 = vpack.c.bf16 %v530_v42, %v529_v40  ;;  %v456_v47 = vpop.f32.mrf.mxu2  ;;  %v461_v48 = vpop.f32.mrf.mxu3 }
  0xb9   : > { %v500_v51 = vadd.f32 %v842_v14, %v456_v47  ;;  %v502_v52 = vadd.f32 %v842_v14, %v461_v48 }
  0xba   : > { %772 = vst [vmem:[%s317_s24] sm:$0xff] %v771_v45  }
  0xbb   : > { %791 = vst [vmem:[%s317_s24 + $0x8] sm:$0xff] %v776_v46   ;;  %v524_v53 = vadd.f32 %v763_v43, %v500_v51  ;;  %v526_v54 = vadd.f32 %v767_v44, %v502_v52 }
  0xbd   : > { %v532_v57 = vmax.f32 %v524_v53, 0.0  ;;  %v534_v58 = vmax.f32 %v526_v54, 0.0 }
  0xbf   : > { %v781_v59 = vpack.c.bf16 %v532_v57, %v531_v55  ;;  %v786_v60 = vpack.c.bf16 %v534_v58, %v533_v56 }
  0xc1   : > { %792 = vst [vmem:[%s317_s24 + $0x10] sm:$0xff] %v781_v59  }
  0xc2   : > { %793 = vst [vmem:[%s317_s24 + $0x18] sm:$0xff] %v786_v60  }
  0xc3 PF: > { %s14_s17 = sadd.s32 1, %s865_s17   ;;  %s968_s15 = smov %s861_s16 }
  0xc4   : > { %p11_p5 = scmp.ge.s32.totalorder %s14_s17, 4   ;;  %s969_s16 = smov %s971_s18 }
  0xc6   :  { %13 = sbr.rel (!%p11_p5) target bundleno = 2 (0x2), region = 83 }

</bundles_post_ra>
